<compile_context>
chip_gen: v5e
topology: v5e:2x2
jax: 0.10.0
libtpu: 0.0.40
codegen_flags: <defaults>
</compile_context>

<pallas_src>
import functools
import math

import jax
import jax.numpy as jnp
from jax import lax
from jax.experimental import pallas as pl
from jax.experimental.pallas import tpu as pltpu


_ACC_CAP_ELEMS = 32 * 1024                 # ~32 f32 vregs for a register-resident accumulator
_VMEM_BUDGET_BYTES = 12 * 1024 * 1024      # conservative: fits v7x scoped VMEM with headroom


def _resolve_pool_args(pool, p2, p3, s1, s2, s3):
    """Replicates AVGPooling3D.__init__ default-argument logic."""
    if p2 is None:
        p2 = pool
    if p3 is None:
        p3 = p2
    kernel = (pool, p2, p3)
    if s1 is None:
        s1 = pool
    if s2 is None:
        s2 = p2
    if s3 is None:
        s3 = p3
    return kernel, (s1, s2, s3)


def _pad_spatial_ndhwc(x, kernel):
    """Replicates the module's pad(): zero-pad only when kernel exceeds the spatial extent."""
    _, D, H, W, _ = x.shape
    diffs = (max(kernel[0] - D, 0), max(kernel[1] - H, 0), max(kernel[2] - W, 0))
    if not any(diffs):
        return x
    pads = [(0, 0)]
    for d in diffs:
        pads.append((int(math.ceil(d / 2)), int(math.floor(d / 2))))
    pads.append((0, 0))
    return jnp.pad(x, pads)


def _choose_tiles(Dp, Hp, Wp, C, Do, Ho, Wo, kernel, stride, itemsize):
    """Pick (channel tile, output-D tile, d_tiled) under VMEM + accumulator budgets."""
    k0, s0 = kernel[0], stride[0]
    d_tiled = (s0 == k0)  # non-overlapping, gap-free along D -> disjoint Blocked tiles
    tdo_cands = [d for d in range(Do, 0, -1) if Do % d == 0] if d_tiled else [Do]
    tc_cands = [C]
    if C > 128:
        # lane-dense channel tiles (multiples of 128) when C is large
        tc_cands += [c for c in range((C // 128) * 128, 0, -128) if C % c == 0 and c != C]

    def fits(tC, tDo, cap_acc):
        d_in = tDo * k0 if d_tiled else Dp
        in_b = d_in * Hp * Wp * tC * itemsize
        out_b = tDo * Ho * Wo * tC * itemsize
        acc_e = tDo * Ho * Wo * tC
        if cap_acc and acc_e > _ACC_CAP_ELEMS:
            return False
        return 2 * (in_b + out_b) + 4 * acc_e <= _VMEM_BUDGET_BYTES

    # Prefer the largest tile whose accumulator stays register-resident; otherwise the
    # largest tile that fits VMEM (VMEM-scratch accumulation path).
    for cap_acc in (True, False):
        for tC in tc_cands:
            for tDo in tdo_cands:
                if fits(tC, tDo, cap_acc):
                    return tC, tDo, d_tiled
    # Nothing fits the budget: take the smallest blocks and let the compiler cope.
    return tc_cands[-1], tdo_cands[-1], d_tiled


def _avgpool3d_kernel(x_ref, o_ref, *scratch, kernel, stride):
    # x_ref block: (1, D_blk, Hp, Wp, tC)   o_ref block: (1, tDo, Ho, Wo, tC)
    k0, k1, k2 = kernel
    s0, s1, s2 = stride
    _, tDo, Ho, Wo, _ = o_ref.shape
    inv_vol = 1.0 / float(k0 * k1 * k2)  # AvgPool3d divisor (count_include_pad=True default)

    def win(start, size, st):
        return pl.ds(start, size) if st == 1 else pl.ds(start, size, stride=st)

    def tap(kd, kh, kw):
        # Strided vector loads straight from the VMEM ref; the lane (channel) dim is never
        # sliced, D/H strides are addressing, W stride is a sublane-strided load.
        return x_ref[:, win(kd, tDo, s0), win(kh, Ho, s1), win(kw, Wo, s2), :].astype(
            jnp.float32
        )

    taps = [(kd, kh, kw) for kd in range(k0) for kh in range(k1) for kw in range(k2)]
    # Pooling windows in this search space are small -> static unroll of the tap loop.
    # (For very large windows a bounded lax.fori_loop over the taps would be preferable.)
    if scratch:
        # Large output tile: accumulate in an f32 VMEM scratch, store to o_ref once.
        acc_ref = scratch[0]
        acc_ref[...] = tap(*taps[0])
        for t in taps[1:]:
            acc_ref[...] += tap(*t)
        o_ref[...] = (acc_ref[...] * inv_vol).astype(o_ref.dtype)
    else:
        # Small output tile: register-resident accumulator, single store per tile.
        acc = tap(*taps[0])
        for t in taps[1:]:
            acc = acc + tap(*t)
        o_ref[...] = (acc * inv_vol).astype(o_ref.dtype)


def avg_pooling_3d_ndhwc(x_ndhwc, pool, p2=None, p3=None, s1=None, s2=None, s3=None):
    """AVGPooling3D.forward for channels-last (NDHWC) input; no layout round-trips."""
    kernel, stride = _resolve_pool_args(pool, p2, p3, s1, s2, s3)

    x = _pad_spatial_ndhwc(x_ndhwc, kernel)
    N, Dp, Hp, Wp, C = x.shape
    Do = (Dp - kernel[0]) // stride[0] + 1
    Ho = (Hp - kernel[1]) // stride[1] + 1
    Wo = (Wp - kernel[2]) // stride[2] + 1

    tC, tDo, d_tiled = _choose_tiles(
        Dp, Hp, Wp, C, Do, Ho, Wo, kernel, stride, x.dtype.itemsize
    )
    d_in_blk = tDo * kernel[0] if d_tiled else Dp
    use_scratch = (tDo * Ho * Wo * tC) > _ACC_CAP_ELEMS
    scratch_shapes = (
        [pltpu.VMEM((1, tDo, Ho, Wo, tC), jnp.float32)] if use_scratch else []
    )

    grid = (N, C // tC, Do // tDo)

    kern = functools.partial(_avgpool3d_kernel, kernel=kernel, stride=stride)

    return pl.pallas_call(
        kern,
        out_shape=jax.ShapeDtypeStruct((N, Do, Ho, Wo, C), x.dtype),
        grid_spec=pltpu.PrefetchScalarGridSpec(
            num_scalar_prefetch=0,
            grid=grid,
            in_specs=[
                pl.BlockSpec(
                    (1, d_in_blk, Hp, Wp, tC), lambda n, c, d: (n, d, 0, 0, c)
                ),
            ],
            out_specs=pl.BlockSpec(
                (1, tDo, Ho, Wo, tC), lambda n, c, d: (n, d, 0, 0, c)
            ),
            scratch_shapes=scratch_shapes,
        ),
        compiler_params=pltpu.CompilerParams(
            dimension_semantics=("parallel",) * len(grid),
            vmem_limit_bytes=32 * 1024 * 1024,
        ),
    )(x)


def avg_pooling_3d(x_ncdhw, pool, p2=None, p3=None, s1=None, s2=None, s3=None):
    """PyTorch-compatible NCDHW entry point (matches AVGPooling3D.forward exactly).

    The NCDHW<->NDHWC transposes here are boundary layout plumbing only; callers that can
    stay channels-last should use `avg_pooling_3d_ndhwc` directly to avoid them.
    """
    x = jnp.transpose(x_ncdhw, (0, 2, 3, 4, 1))  # NCDHW -> NDHWC
    out = avg_pooling_3d_ndhwc(x, pool, p2, p3, s1, s2, s3)
    return jnp.transpose(out, (0, 4, 1, 2, 3))   # NDHWC -> NCDHW


def _reference_avg_pool(x_ncdhw, pool, p2=None, p3=None, s1=None, s2=None, s3=None):
    """Pure-JAX reference (reduce_window), same padding semantics as the module."""
    kernel, stride = _resolve_pool_args(pool, p2, p3, s1, s2, s3)
    x = x_ncdhw
    _, _, D, H, W = x.shape
    diffs = (max(kernel[0] - D, 0), max(kernel[1] - H, 0), max(kernel[2] - W, 0))
    if any(diffs):
        pads = [(0, 0), (0, 0)]
        for d in diffs:
            pads.append((int(math.ceil(d / 2)), int(math.floor(d / 2))))
        x = jnp.pad(x, pads)
    summed = lax.reduce_window(
        x, 0.0, lax.add,
        window_dimensions=(1, 1) + kernel,
        window_strides=(1, 1) + stride,
        padding="VALID",
    )
    return summed / float(kernel[0] * kernel[1] * kernel[2])


if __name__ == "__main__":
    key = jax.random.PRNGKey(0)

    # Case 1: module defaults (stride == kernel), NCDHW like the PyTorch module.
    x1 = jax.random.normal(key, (2, 4, 8, 8, 8), dtype=jnp.float32)
    out1 = jax.block_until_ready(avg_pooling_3d(x1, 2))
    ref1 = _reference_avg_pool(x1, 2)
    assert out1.shape == ref1.shape == (2, 4, 4, 4, 4), (out1.shape, ref1.shape)
    assert jnp.allclose(out1, ref1, atol=1e-5, rtol=1e-5)

    # Case 2: overlapping windows (stride != kernel) -> untiled-D path.
    out2 = jax.block_until_ready(avg_pooling_3d(x1, 3, s1=2, s2=2, s3=2))
    ref2 = _reference_avg_pool(x1, 3, s1=2, s2=2, s3=2)
    assert out2.shape == ref2.shape, (out2.shape, ref2.shape)
    assert jnp.allclose(out2, ref2, atol=1e-5, rtol=1e-5)

    # Case 3: kernel exceeds the D extent -> module's zero-pad path.
    x3 = jax.random.normal(jax.random.PRNGKey(1), (1, 4, 2, 8, 8), dtype=jnp.float32)
    out3 = jax.block_until_ready(avg_pooling_3d(x3, 4, p2=2, p3=2))
    ref3 = _reference_avg_pool(x3, 4, p2=2, p3=2)
    assert out3.shape == ref3.shape, (out3.shape, ref3.shape)
    assert jnp.allclose(out3, ref3, atol=1e-5, rtol=1e-5)

    print("KERNEL_OK")
</pallas_src>

<mosaic_0001>
module attributes {stable_mosaic.version = 11 : i64} {
  func.func @_avgpool3d_kernel(%arg0: i32, %arg1: i32, %arg2: i32, %arg3: memref<1x8x8x8x4xf32, #tpu.memory_space<vmem>>, %arg4: memref<1x4x4x4x4xf32, #tpu.memory_space<vmem>>) attributes {dimension_semantics = [#tpu.dimension_semantics<parallel>, #tpu.dimension_semantics<parallel>, #tpu.dimension_semantics<parallel>], iteration_bounds = array<i64: 2, 1, 1>, scalar_prefetch = 0 : i64, scratch_operands = 0 : i64, tpu.core_type = #tpu.core_type<tc>, window_params = [{transform_indices = @transform_0, window_bounds = array<i64: 1, 8, 8, 8, 4>}, {transform_indices = @transform_1, window_bounds = array<i64: 1, 4, 4, 4, 4>}]} {
    %c0 = arith.constant 0 : index
    %c0_0 = arith.constant 0 : index
    %c0_1 = arith.constant 0 : index
    %c0_2 = arith.constant 0 : index
    %c0_3 = arith.constant 0 : index
    %0 = tpu.strided_load %arg3[%c0, %c0_0, %c0_1, %c0_2, %c0_3] {strides = array<i32: 1, 2, 2, 2, 1>} : memref<1x8x8x8x4xf32, #tpu.memory_space<vmem>>, vector<1x4x4x4x4xf32>
    %c0_4 = arith.constant 0 : index
    %c0_5 = arith.constant 0 : index
    %c0_6 = arith.constant 0 : index
    %c1 = arith.constant 1 : index
    %c0_7 = arith.constant 0 : index
    %1 = tpu.strided_load %arg3[%c0_4, %c0_5, %c0_6, %c1, %c0_7] {strides = array<i32: 1, 2, 2, 2, 1>} : memref<1x8x8x8x4xf32, #tpu.memory_space<vmem>>, vector<1x4x4x4x4xf32>
    %2 = arith.addf %0, %1 : vector<1x4x4x4x4xf32>
    %c0_8 = arith.constant 0 : index
    %c0_9 = arith.constant 0 : index
    %c1_10 = arith.constant 1 : index
    %c0_11 = arith.constant 0 : index
    %c0_12 = arith.constant 0 : index
    %3 = tpu.strided_load %arg3[%c0_8, %c0_9, %c1_10, %c0_11, %c0_12] {strides = array<i32: 1, 2, 2, 2, 1>} : memref<1x8x8x8x4xf32, #tpu.memory_space<vmem>>, vector<1x4x4x4x4xf32>
    %4 = arith.addf %2, %3 : vector<1x4x4x4x4xf32>
    %c0_13 = arith.constant 0 : index
    %c0_14 = arith.constant 0 : index
    %c1_15 = arith.constant 1 : index
    %c1_16 = arith.constant 1 : index
    %c0_17 = arith.constant 0 : index
    %5 = tpu.strided_load %arg3[%c0_13, %c0_14, %c1_15, %c1_16, %c0_17] {strides = array<i32: 1, 2, 2, 2, 1>} : memref<1x8x8x8x4xf32, #tpu.memory_space<vmem>>, vector<1x4x4x4x4xf32>
    %6 = arith.addf %4, %5 : vector<1x4x4x4x4xf32>
    %c0_18 = arith.constant 0 : index
    %c1_19 = arith.constant 1 : index
    %c0_20 = arith.constant 0 : index
    %c0_21 = arith.constant 0 : index
    %c0_22 = arith.constant 0 : index
    %7 = tpu.strided_load %arg3[%c0_18, %c1_19, %c0_20, %c0_21, %c0_22] {strides = array<i32: 1, 2, 2, 2, 1>} : memref<1x8x8x8x4xf32, #tpu.memory_space<vmem>>, vector<1x4x4x4x4xf32>
    %8 = arith.addf %6, %7 : vector<1x4x4x4x4xf32>
    %c0_23 = arith.constant 0 : index
    %c1_24 = arith.constant 1 : index
    %c0_25 = arith.constant 0 : index
    %c1_26 = arith.constant 1 : index
    %c0_27 = arith.constant 0 : index
    %9 = tpu.strided_load %arg3[%c0_23, %c1_24, %c0_25, %c1_26, %c0_27] {strides = array<i32: 1, 2, 2, 2, 1>} : memref<1x8x8x8x4xf32, #tpu.memory_space<vmem>>, vector<1x4x4x4x4xf32>
    %10 = arith.addf %8, %9 : vector<1x4x4x4x4xf32>
    %c0_28 = arith.constant 0 : index
    %c1_29 = arith.constant 1 : index
    %c1_30 = arith.constant 1 : index
    %c0_31 = arith.constant 0 : index
    %c0_32 = arith.constant 0 : index
    %11 = tpu.strided_load %arg3[%c0_28, %c1_29, %c1_30, %c0_31, %c0_32] {strides = array<i32: 1, 2, 2, 2, 1>} : memref<1x8x8x8x4xf32, #tpu.memory_space<vmem>>, vector<1x4x4x4x4xf32>
    %12 = arith.addf %10, %11 : vector<1x4x4x4x4xf32>
    %c0_33 = arith.constant 0 : index
    %c1_34 = arith.constant 1 : index
    %c1_35 = arith.constant 1 : index
    %c1_36 = arith.constant 1 : index
    %c0_37 = arith.constant 0 : index
    %13 = tpu.strided_load %arg3[%c0_33, %c1_34, %c1_35, %c1_36, %c0_37] {strides = array<i32: 1, 2, 2, 2, 1>} : memref<1x8x8x8x4xf32, #tpu.memory_space<vmem>>, vector<1x4x4x4x4xf32>
    %14 = arith.addf %12, %13 : vector<1x4x4x4x4xf32>
    %cst = arith.constant 1.250000e-01 : f32
    %15 = vector.broadcast %cst : f32 to vector<1x4x4x4x4xf32>
    %16 = arith.mulf %14, %15 : vector<1x4x4x4x4xf32>
    %c0_38 = arith.constant 0 : index
    %c0_39 = arith.constant 0 : index
    %c0_40 = arith.constant 0 : index
    %c0_41 = arith.constant 0 : index
    %c0_42 = arith.constant 0 : index
    %17 = vector.load %arg4[%c0_38, %c0_39, %c0_40, %c0_41, %c0_42] : memref<1x4x4x4x4xf32, #tpu.memory_space<vmem>>, vector<1x4x4x4x4xf32>
    tpu.vector_store %arg4[%c0_38, %c0_39, %c0_40, %c0_41, %c0_42], %16 {strides = array<i32>} : memref<1x4x4x4x4xf32, #tpu.memory_space<vmem>>, vector<1x4x4x4x4xf32>,
    return
  }
  func.func @transform_0(%arg0: i32, %arg1: i32, %arg2: i32) -> (i32, i32, i32, i32, i32) {
    %c0_i32 = arith.constant 0 : i32
    %c0_i32_0 = arith.constant 0 : i32
    %c0_i32_1 = arith.constant 0 : i32
    return %arg0, %arg2, %c0_i32, %c0_i32_0, %arg1 : i32, i32, i32, i32, i32
  }
  func.func @transform_1(%arg0: i32, %arg1: i32, %arg2: i32) -> (i32, i32, i32, i32, i32) {
    %c0_i32 = arith.constant 0 : i32
    %c0_i32_0 = arith.constant 0 : i32
    %c0_i32_1 = arith.constant 0 : i32
    return %arg0, %arg2, %c0_i32, %c0_i32_0, %arg1 : i32, i32, i32, i32, i32
  }
}

</mosaic_0001>

<bundles_post_ra>
// kernel: tpu_custom_call.1
= control target key start
LH: loop header
LB: loop body
LE: loop exit
PB: predicated region body
PF: predicated region fallthrough
CT: control target
= control target key end

     0   :  { %6 = vsyncpa [#allocation3], 0  ;;  %s1331_s0 = inlined_call_operand.vmem [shape: f32[2,8,8,8,4], index: 0, kind: input, shape index: {}]   ;;  %s1332_s1 = inlined_call_operand.hbm [shape: f32[2,4,4,4,4], index: 1, kind: output, shape index: {}]  }
   0x1   :  { %8 = vsyncpa [#allocation3 + $0x1], 0  ;;  %s1062_s6 = smov 0   ;;  %s1064_s7 = smov 0  }
   0x2   :  { %s1066_s8 = smov 0   ;;  %s1068_s9 = smov 0  }
   0x3   :  { %s1070_s10 = smov 0   ;;  %s1072_s11 = smov 0  }
   0x4 LB: > { %s771_s12 = sadd.s32 4294967295, %s1048_s11   ;;  %s772_s13 = sadd.s32 4294967294, %s1048_s11   ;;  %s1048_s11 = sphi %s1072_s11, %s14_s11   ;;  %s1044_s10 = sphi %s1070_s10, %s1339_s10   ;;  %s1040_s9 = sphi %s1068_s9, %s1338_s9   ;;  %s1036_s8 = sphi %s1066_s8, %s1337_s8   ;;  %s1032_s7 = sphi %s1064_s7, %s1336_s7   ;;  %s1028_s6 = sphi %s1062_s6, %s1335_s6  }
   0x5   : > { %s33_s14 = sadd.s32 1, %s1044_s10  ;;  %s74_s15 = sadd.s32 1, %s1036_s8 }
   0x6   : > { %p35_p0 = scmp.ge.s32.totalorder %s33_s14, 2  ;;  %p84_p1 = scmp.ne.s32.totalorder %s1036_s8, %s1032_s7 }
   0x7   : > { %p85_p2 = scmp.eq.s32.totalorder %s771_s12, 1  ;;  %p90_p3 = scmp.ne.s32.totalorder %s1032_s7, %s1028_s6 }
   0x8   : > { %s1341_s14 = smov (%p35_p0, %s33_s14), 0  ;;  %p91_p5 = scmp.eq.s32.totalorder %s772_s13, 1 }
   0x9   : > { %p1102_p4 = por %p85_p2, %p84_p1  ;;  %s67_s17 = ssub.s32 %s1044_s10, %s1341_s14 }
   0xa   : > { %p775_p6 = scmp.ge.s32.totalorder %s1048_s11, 1  ;;  %p72_p7 = scmp.eq.s32.totalorder %s67_s17, 0 }
   0xb   : > { %p1109_p8 = por %p91_p5, %p90_p3  ;;  %p126_p9 = scmp.lt.s32.totalorder %s1048_s11, 3 }
   0xc   : > { %s1115_s19 = scalar_select %p72_p7, %s1036_s8, %s74_s15  }
   0xd   : > { %p127_p10 = pnand %p775_p6, %p126_p9 }
   0xe   : > { %p155_p11 = scmp.lt.s32.totalorder (!%p127_p10), %s1040_s9, 1  ;;  %s151_s22 = sand.u32 (!%p127_p10), 1, %s1032_s7  }
   0xf   : > { %130 = sbr.rel (%p127_p10) target bundleno = 116 (0x74), region = 24  ;;  %s1130_s26 = sshll.u32 (!%p127_p10), %s151_s22, 6 }
  0x10   : > { %s1161_s27 = scalar_lea.vmem (!%p127_p10), [#allocation2], %s1130_s26  ;;  %s912_s28 = sshll.u32 (!%p127_p10), %s1040_s9, 6 }
  0x11   : > { %s585_s2 = scalar_lea.hbm (!%p127_p10), %s1332_s1, %s912_s28  ;;  %s586_s3 = sshll.u32 (!%p127_p10), %s1161_s27, 4  ;;  %s587_s3 = int_to_ptr.vmem [resolvable:$true] %s586_s3 }
  0x12   : > { %s588_s4 = sshll.u32 (!%p127_p10), %s585_s2, 4  ;;  %s570_s5 = scalar_lea.sflag (!%p127_p10), [#allocation3], %s151_s22  ;;  %s589_s4 = int_to_ptr.hbm [resolvable:$true] %s588_s4 }
  0x13   : > { %s990_s17 = scalar_lea.hbm (!%p127_p10), %s1332_s1, 128 }
  0x14   : > { %s156_s20 = scalar_select %p155_p11, %s1040_s9, 1  ;;  %vm552_vm0 = vcmask 27648  }
  0x15   : > { %s984_s9 = sshra.s32 %s589_s4, 4  ;;  %s985_s9 = int_to_ptr.hbm [resolvable:$true] %s984_s9 }
  0x16   : > { %s911_s21 = sshll.u32 %s156_s20, 9  ;;  %s986_s12 = scalar_lea.hbm %s985_s9, 64 }
  0x17   : > { %s1123_s25 = scalar_lea.vmem %s1331_s0, %s911_s21  ;;  %p987_p12 = scmp.ne.s32.totalorder %s985_s9, %s986_s12 }
  0x18   : > { %v169_v0 = vld [vmem:[%s1123_s25] ss:$2 sm:$0xf]  ;;  %v794_v1 = vld [vmem:[%s1123_s25 + $0x1] ss:$2 sm:$0xf]  ;;  %p991_p1 = scmp.lt.s32.totalorder %s985_s9, %s1332_s1  ;;  %p992_p2 = scmp.lt.s32.totalorder %s990_s17, %s986_s12 }
  0x19   : > { %v232_v2 = vadd.f32 %v794_v1, %v169_v0  ;;  %v810_v3 = vld [vmem:[%s1123_s25 + $0x8] ss:$2 sm:$0xf]  ;;  %v826_v4 = vld [vmem:[%s1123_s25 + $0x9] ss:$2 sm:$0xf]  ;;  %p988_p13 = pnand %p987_p12, %p1102_p4 }
  0x1a   : > { %v842_v6 = vld [vmem:[%s1123_s25 + $0x40] ss:$2 sm:$0xf]  ;;  %v779_v7 = vld [vmem:[%s1123_s25 + $0x10] ss:$2 sm:$0xf]  ;;  %p993_p3 = por %p992_p2, %p991_p1 }
  0x1b   : > { %v280_v5 = vadd.f32 %v810_v3, %v232_v2  ;;  %v795_v8 = vld [vmem:[%s1123_s25 + $0x11] ss:$2 sm:$0xf]  ;;  %v811_v11 = vld [vmem:[%s1123_s25 + $0x18] ss:$2 sm:$0xf]  ;;  %p989_p0 = pneg %p988_p13 }
  0x1c   : > { %v233_v10 = vadd.f32 %v795_v8, %v779_v7  ;;  %v858_v12 = vld [vmem:[%s1123_s25 + $0x41] ss:$2 sm:$0xf]  ;;  %v827_v13 = vld [vmem:[%s1123_s25 + $0x19] ss:$2 sm:$0xf] }
  0x1d   : > { %v328_v9 = vadd.f32 %v826_v4, %v280_v5  ;;  %v874_v15 = vld [vmem:[%s1123_s25 + $0x48] ss:$2 sm:$0xf]  ;;  %v843_v17 = vld [vmem:[%s1123_s25 + $0x50] ss:$2 sm:$0xf]  ;;  %p994_p5 = pnand %p993_p3, %p989_p0 }
  0x1e   : > { %v281_v16 = vadd.f32 %v811_v11, %v233_v10  ;;  %v780_v18 = vld [vmem:[%s1123_s25 + $0x20] ss:$2 sm:$0xf]  ;;  %v796_v19 = vld [vmem:[%s1123_s25 + $0x21] ss:$2 sm:$0xf] }
  0x1f   : > { %v376_v14 = vadd.f32 %v842_v6, %v328_v9  ;;  %v890_v21 = vld [vmem:[%s1123_s25 + $0x49] ss:$2 sm:$0xf]  ;;  %v234_v23 = vadd.f32 %v796_v19, %v780_v18  ;;  %v812_v24 = vld [vmem:[%s1123_s25 + $0x28] ss:$2 sm:$0xf] }
  0x20   : > { %v329_v22 = vadd.f32 %v827_v13, %v281_v16  ;;  %v859_v25 = vld [vmem:[%s1123_s25 + $0x51] ss:$2 sm:$0xf]  ;;  %v828_v26 = vld [vmem:[%s1123_s25 + $0x29] ss:$2 sm:$0xf] }
  0x21   : > { %v424_v20 = vadd.f32 %v858_v12, %v376_v14  ;;  %v875_v29 = vld [vmem:[%s1123_s25 + $0x58] ss:$2 sm:$0xf]  ;;  %v282_v30 = vadd.f32 %v812_v24, %v234_v23  ;;  %v844_v31 = vld [vmem:[%s1123_s25 + $0x60] ss:$2 sm:$0xf] }
  0x22   : > { %v377_v28 = vadd.f32 %v843_v17, %v329_v22  ;;  %v891_v32 = vld [vmem:[%s1123_s25 + $0x59] ss:$2 sm:$0xf]  ;;  %v781_v33 = vld [vmem:[%s1123_s25 + $0x30] ss:$2 sm:$0xf] }
  0x23   : > { %v472_v27 = vadd.f32 %v874_v15, %v424_v20  ;;  %v797_v34 = vld [vmem:[%s1123_s25 + $0x31] ss:$2 sm:$0xf]  ;;  %v330_v37 = vadd.f32 %v828_v26, %v282_v30  ;;  %v860_v38 = vld [vmem:[%s1123_s25 + $0x61] ss:$2 sm:$0xf] }
  0x24   : > { %v425_v36 = vadd.f32 %v859_v25, %v377_v28  ;;  %v235_v39 = vadd.f32 %v797_v34, %v781_v33  ;;  %v813_v40 = vld [vmem:[%s1123_s25 + $0x38] ss:$2 sm:$0xf]  ;;  %v876_v41 = vld [vmem:[%s1123_s25 + $0x68] ss:$2 sm:$0xf] }
  0x25   : > { %v520_v35 = vadd.f32 %v890_v21, %v472_v27  ;;  %v829_v42 = vld [vmem:[%s1123_s25 + $0x39] ss:$2 sm:$0xf]  ;;  %v378_v45 = vadd.f32 %v844_v31, %v330_v37  ;;  %v845_v47 = vld [vmem:[%s1123_s25 + $0x70] ss:$2 sm:$0xf] }
  0x26   : > { %v473_v44 = vadd.f32 %v875_v29, %v425_v36  ;;  %v283_v46 = vadd.f32 %v813_v40, %v235_v39  ;;  %v892_v48 = vld [vmem:[%s1123_s25 + $0x69] ss:$2 sm:$0xf]  ;;  %v861_v49 = vld [vmem:[%s1123_s25 + $0x71] ss:$2 sm:$0xf] }
  0x27   : > { %v536_v43 = vmul.f32 0.125, %v520_v35  ;;  %v782_v50 = vld [vmem:[%s1123_s25 + $0x80] ss:$2 sm:$0xf]  ;;  %v426_v52 = vadd.f32 %v860_v38, %v378_v45 }
  0x28   : > { %v521_v51 = vadd.f32 %v891_v32, %v473_v44  ;;  %v331_v53 = vadd.f32 %v829_v42, %v283_v46  ;;  %v798_v54 = vld [vmem:[%s1123_s25 + $0x81] ss:$2 sm:$0xf]  ;;  %v877_v55 = vld [vmem:[%s1123_s25 + $0x78] ss:$2 sm:$0xf] }
  0x29   : > { %553 = vst.msk [vmem:[%s1161_s27] sm:$0xf] %vm552_vm0, %v536_v43  ;;  %v236_v56 = vadd.f32 %v798_v54, %v782_v50  ;;  %v814_v57 = vld [vmem:[%s1123_s25 + $0x88] ss:$2 sm:$0xf]  ;;  %v474_v59 = vadd.f32 %v876_v41, %v426_v52 }
  0x2a   : > { %v537_v58 = vmul.f32 0.125, %v521_v51  ;;  %v379_v60 = vadd.f32 %v845_v47, %v331_v53  ;;  %v830_v61 = vld [vmem:[%s1123_s25 + $0x89] ss:$2 sm:$0xf] }
  0x2b   : > { %v893_v62 = vld [vmem:[%s1123_s25 + $0x79] ss:$2 sm:$0xf]  ;;  %v284_v63 = vadd.f32 %v814_v57, %v236_v56  ;;  %v846_v0 = vld [vmem:[%s1123_s25 + $0xc0] ss:$2 sm:$0xf]  ;;  %v522_v1 = vadd.f32 %v892_v48, %v474_v59 }
  0x2c   : > { %554 = vst.msk [vmem:[%s1161_s27 + $0x4] sm:$0xf] %vm552_vm0, %v537_v58  ;;  %v427_v2 = vadd.f32 %v861_v49, %v379_v60  ;;  %v862_v3 = vld [vmem:[%s1123_s25 + $0xc1] ss:$2 sm:$0xf] }
  0x2d   : > { %v332_v4 = vadd.f32 %v830_v61, %v284_v63  ;;  %v783_v5 = vld [vmem:[%s1123_s25 + $0x90] ss:$2 sm:$0xf]  ;;  %v799_v6 = vld [vmem:[%s1123_s25 + $0x91] ss:$2 sm:$0xf] }
  0x2e   : > { %v538_v7 = vmul.f32 0.125, %v522_v1  ;;  %v475_v8 = vadd.f32 %v877_v55, %v427_v2  ;;  %v237_v9 = vadd.f32 %v799_v6, %v783_v5  ;;  %v815_v10 = vld [vmem:[%s1123_s25 + $0x98] ss:$2 sm:$0xf] }
  0x2f   : > { %v380_v11 = vadd.f32 %v846_v0, %v332_v4  ;;  %v878_v12 = vld [vmem:[%s1123_s25 + $0xc8] ss:$2 sm:$0xf]  ;;  %v831_v13 = vld [vmem:[%s1123_s25 + $0x99] ss:$2 sm:$0xf] }
  0x30   : > { %555 = vst.msk [vmem:[%s1161_s27 + $0x8] sm:$0xf] %vm552_vm0, %v538_v7  ;;  %v523_v14 = vadd.f32 %v893_v62, %v475_v8  ;;  %v894_v15 = vld [vmem:[%s1123_s25 + $0xc9] ss:$2 sm:$0xf]  ;;  %v285_v16 = vadd.f32 %v815_v10, %v237_v9 }
  0x31   : > { %v428_v17 = vadd.f32 %v862_v3, %v380_v11  ;;  %v847_v18 = vld [vmem:[%s1123_s25 + $0xd0] ss:$2 sm:$0xf]  ;;  %v863_v19 = vld [vmem:[%s1123_s25 + $0xd1] ss:$2 sm:$0xf] }
  0x32   : > { %v539_v20 = vmul.f32 0.125, %v523_v14  ;;  %v333_v21 = vadd.f32 %v831_v13, %v285_v16  ;;  %v784_v22 = vld [vmem:[%s1123_s25 + $0xa0] ss:$2 sm:$0xf] }
  0x33   : > { %v476_v23 = vadd.f32 %v878_v12, %v428_v17  ;;  %v800_v24 = vld [vmem:[%s1123_s25 + $0xa1] ss:$2 sm:$0xf]  ;;  %v816_v25 = vld [vmem:[%s1123_s25 + $0xa8] ss:$2 sm:$0xf] }
  0x34   : > { %556 = vst.msk [vmem:[%s1161_s27 + $0xc] sm:$0xf] %vm552_vm0, %v539_v20  ;;  %v381_v26 = vadd.f32 %v847_v18, %v333_v21  ;;  %v238_v27 = vadd.f32 %v800_v24, %v784_v22  ;;  %v879_v29 = vld [vmem:[%s1123_s25 + $0xd8] ss:$2 sm:$0xf] }
  0x35   : > { %v524_v28 = vadd.f32 %v894_v15, %v476_v23  ;;  %v832_v30 = vld [vmem:[%s1123_s25 + $0xa9] ss:$2 sm:$0xf]  ;;  %v895_v32 = vld [vmem:[%s1123_s25 + $0xd9] ss:$2 sm:$0xf] }
  0x36   : > { %v429_v31 = vadd.f32 %v863_v19, %v381_v26  ;;  %v286_v33 = vadd.f32 %v816_v25, %v238_v27  ;;  %v848_v34 = vld [vmem:[%s1123_s25 + $0xe0] ss:$2 sm:$0xf]  ;;  %v785_v36 = vld [vmem:[%s1123_s25 + $0xb0] ss:$2 sm:$0xf] }
  0x37   : > { %v540_v35 = vmul.f32 0.125, %v524_v28  ;;  %v801_v39 = vld [vmem:[%s1123_s25 + $0xb1] ss:$2 sm:$0xf] }
  0x38   : > { %v477_v37 = vadd.f32 %v879_v29, %v429_v31  ;;  %v334_v38 = vadd.f32 %v832_v30, %v286_v33  ;;  %v817_v40 = vld [vmem:[%s1123_s25 + $0xb8] ss:$2 sm:$0xf]  ;;  %v864_v41 = vld [vmem:[%s1123_s25 + $0xe1] ss:$2 sm:$0xf]  ;;  %v239_v42 = vadd.f32 %v801_v39, %v785_v36 }
  0x39   : > { %557 = vst.msk [vmem:[%s1161_s27 + $0x10] sm:$0xf] %vm552_vm0, %v540_v35  ;;  %v880_v45 = vld [vmem:[%s1123_s25 + $0xe8] ss:$2 sm:$0xf] }
  0x3a   : > { %v525_v43 = vadd.f32 %v895_v32, %v477_v37  ;;  %v382_v44 = vadd.f32 %v848_v34, %v334_v38  ;;  %v833_v46 = vld [vmem:[%s1123_s25 + $0xb9] ss:$2 sm:$0xf]  ;;  %v896_v47 = vld [vmem:[%s1123_s25 + $0xe9] ss:$2 sm:$0xf]  ;;  %v287_v48 = vadd.f32 %v817_v40, %v239_v42 }
  0x3b   : > { %v849_v49 = vld [vmem:[%s1123_s25 + $0xf0] ss:$2 sm:$0xf]  ;;  %v786_v52 = vld [vmem:[%s1123_s25 + $0x100] ss:$2 sm:$0xf] }
  0x3c   : > { %v541_v50 = vmul.f32 0.125, %v525_v43  ;;  %v430_v51 = vadd.f32 %v864_v41, %v382_v44  ;;  %v335_v53 = vadd.f32 %v833_v46, %v287_v48  ;;  %v802_v54 = vld [vmem:[%s1123_s25 + $0x101] ss:$2 sm:$0xf] }
  0x3d   : > { %v818_v55 = vld [vmem:[%s1123_s25 + $0x108] ss:$2 sm:$0xf]  ;;  %v865_v57 = vld [vmem:[%s1123_s25 + $0xf1] ss:$2 sm:$0xf]  ;;  %v240_v58 = vadd.f32 %v802_v54, %v786_v52 }
  0x3e   : > { %558 = vst.msk [vmem:[%s1161_s27 + $0x14] sm:$0xf] %vm552_vm0, %v541_v50  ;;  %v478_v56 = vadd.f32 %v880_v45, %v430_v51  ;;  %v383_v59 = vadd.f32 %v849_v49, %v335_v53  ;;  %v881_v60 = vld [vmem:[%s1123_s25 + $0xf8] ss:$2 sm:$0xf] }
  0x3f   : > { %v834_v61 = vld [vmem:[%s1123_s25 + $0x109] ss:$2 sm:$0xf]  ;;  %v897_v63 = vld [vmem:[%s1123_s25 + $0xf9] ss:$2 sm:$0xf]  ;;  %v288_v0 = vadd.f32 %v818_v55, %v240_v58 }
  0x40   : > { %v526_v62 = vadd.f32 %v896_v47, %v478_v56  ;;  %v850_v1 = vld [vmem:[%s1123_s25 + $0x140] ss:$2 sm:$0xf]  ;;  %v431_v2 = vadd.f32 %v865_v57, %v383_v59  ;;  %v787_v3 = vld [vmem:[%s1123_s25 + $0x110] ss:$2 sm:$0xf] }
  0x41   : > { %v803_v4 = vld [vmem:[%s1123_s25 + $0x111] ss:$2 sm:$0xf]  ;;  %v336_v6 = vadd.f32 %v834_v61, %v288_v0  ;;  %v819_v8 = vld [vmem:[%s1123_s25 + $0x118] ss:$2 sm:$0xf] }
  0x42   : > { %v542_v5 = vmul.f32 0.125, %v526_v62  ;;  %v241_v7 = vadd.f32 %v803_v4, %v787_v3  ;;  %v479_v9 = vadd.f32 %v881_v60, %v431_v2  ;;  %v866_v10 = vld [vmem:[%s1123_s25 + $0x141] ss:$2 sm:$0xf] }
  0x43   : > { %v835_v11 = vld [vmem:[%s1123_s25 + $0x119] ss:$2 sm:$0xf]  ;;  %v384_v12 = vadd.f32 %v850_v1, %v336_v6  ;;  %v882_v13 = vld [vmem:[%s1123_s25 + $0x148] ss:$2 sm:$0xf] }
  0x44   : > { %559 = vst.msk [vmem:[%s1161_s27 + $0x18] sm:$0xf] %vm552_vm0, %v542_v5  ;;  %v289_v14 = vadd.f32 %v819_v8, %v241_v7  ;;  %v527_v15 = vadd.f32 %v897_v63, %v479_v9  ;;  %v898_v16 = vld [vmem:[%s1123_s25 + $0x149] ss:$2 sm:$0xf] }
  0x45   : > { %v851_v17 = vld [vmem:[%s1123_s25 + $0x150] ss:$2 sm:$0xf]  ;;  %v867_v18 = vld [vmem:[%s1123_s25 + $0x151] ss:$2 sm:$0xf]  ;;  %v432_v19 = vadd.f32 %v866_v10, %v384_v12 }
  0x46   : > { %v337_v20 = vadd.f32 %v835_v11, %v289_v14  ;;  %v788_v21 = vld [vmem:[%s1123_s25 + $0x120] ss:$2 sm:$0xf]  ;;  %v804_v22 = vld [vmem:[%s1123_s25 + $0x121] ss:$2 sm:$0xf] }
  0x47   : > { %v543_v23 = vmul.f32 0.125, %v527_v15  ;;  %v242_v24 = vadd.f32 %v804_v22, %v788_v21  ;;  %v820_v25 = vld [vmem:[%s1123_s25 + $0x128] ss:$2 sm:$0xf]  ;;  %v480_v26 = vadd.f32 %v882_v13, %v432_v19 }
  0x48   : > { %v385_v27 = vadd.f32 %v851_v17, %v337_v20  ;;  %v883_v28 = vld [vmem:[%s1123_s25 + $0x158] ss:$2 sm:$0xf]  ;;  %v836_v29 = vld [vmem:[%s1123_s25 + $0x129] ss:$2 sm:$0xf] }
  0x49   : > { %560 = vst.msk [vmem:[%s1161_s27 + $0x1c] sm:$0xf] %vm552_vm0, %v543_v23  ;;  %v899_v30 = vld [vmem:[%s1123_s25 + $0x159] ss:$2 sm:$0xf]  ;;  %v290_v31 = vadd.f32 %v820_v25, %v242_v24  ;;  %v528_v32 = vadd.f32 %v898_v16, %v480_v26 }
  0x4a   : > { %v433_v33 = vadd.f32 %v867_v18, %v385_v27  ;;  %v852_v34 = vld [vmem:[%s1123_s25 + $0x160] ss:$2 sm:$0xf]  ;;  %v868_v35 = vld [vmem:[%s1123_s25 + $0x161] ss:$2 sm:$0xf] }
  0x4b   : > { %v338_v36 = vadd.f32 %v836_v29, %v290_v31  ;;  %v789_v37 = vld [vmem:[%s1123_s25 + $0x130] ss:$2 sm:$0xf]  ;;  %v805_v38 = vld [vmem:[%s1123_s25 + $0x131] ss:$2 sm:$0xf] }
  0x4c   : > { %v544_v39 = vmul.f32 0.125, %v528_v32  ;;  %v481_v40 = vadd.f32 %v883_v28, %v433_v33  ;;  %v243_v41 = vadd.f32 %v805_v38, %v789_v37  ;;  %v821_v42 = vld [vmem:[%s1123_s25 + $0x138] ss:$2 sm:$0xf] }
  0x4d   : > { %v386_v43 = vadd.f32 %v852_v34, %v338_v36  ;;  %v884_v44 = vld [vmem:[%s1123_s25 + $0x168] ss:$2 sm:$0xf]  ;;  %v837_v45 = vld [vmem:[%s1123_s25 + $0x139] ss:$2 sm:$0xf] }
  0x4e   : > { %561 = vst.msk [vmem:[%s1161_s27 + $0x20] sm:$0xf] %vm552_vm0, %v544_v39  ;;  %v529_v46 = vadd.f32 %v899_v30, %v481_v40  ;;  %v900_v47 = vld [vmem:[%s1123_s25 + $0x169] ss:$2 sm:$0xf]  ;;  %v291_v48 = vadd.f32 %v821_v42, %v243_v41 }
  0x4f   : > { %v434_v49 = vadd.f32 %v868_v35, %v386_v43  ;;  %v853_v50 = vld [vmem:[%s1123_s25 + $0x170] ss:$2 sm:$0xf]  ;;  %v869_v51 = vld [vmem:[%s1123_s25 + $0x171] ss:$2 sm:$0xf] }
  0x50   : > { %v545_v52 = vmul.f32 0.125, %v529_v46  ;;  %v339_v53 = vadd.f32 %v837_v45, %v291_v48  ;;  %v790_v54 = vld [vmem:[%s1123_s25 + $0x180] ss:$2 sm:$0xf] }
  0x51   : > { %v482_v55 = vadd.f32 %v884_v44, %v434_v49  ;;  %v806_v56 = vld [vmem:[%s1123_s25 + $0x181] ss:$2 sm:$0xf]  ;;  %v822_v57 = vld [vmem:[%s1123_s25 + $0x188] ss:$2 sm:$0xf] }
  0x52   : > { %562 = vst.msk [vmem:[%s1161_s27 + $0x24] sm:$0xf] %vm552_vm0, %v545_v52  ;;  %v387_v58 = vadd.f32 %v853_v50, %v339_v53  ;;  %v244_v59 = vadd.f32 %v806_v56, %v790_v54  ;;  %v885_v61 = vld [vmem:[%s1123_s25 + $0x178] ss:$2 sm:$0xf] }
  0x53   : > { %v530_v60 = vadd.f32 %v900_v47, %v482_v55  ;;  %v838_v62 = vld [vmem:[%s1123_s25 + $0x189] ss:$2 sm:$0xf]  ;;  %v901_v0 = vld [vmem:[%s1123_s25 + $0x179] ss:$2 sm:$0xf] }
  0x54   : > { %v435_v63 = vadd.f32 %v869_v51, %v387_v58  ;;  %v292_v1 = vadd.f32 %v822_v57, %v244_v59  ;;  %v854_v2 = vld [vmem:[%s1123_s25 + $0x1c0] ss:$2 sm:$0xf]  ;;  %v791_v4 = vld [vmem:[%s1123_s25 + $0x190] ss:$2 sm:$0xf] }
  0x55   : > { %v546_v3 = vmul.f32 0.125, %v530_v60  ;;  %v807_v7 = vld [vmem:[%s1123_s25 + $0x191] ss:$2 sm:$0xf] }
  0x56   : > { %v483_v5 = vadd.f32 %v885_v61, %v435_v63  ;;  %v340_v6 = vadd.f32 %v838_v62, %v292_v1  ;;  %v823_v8 = vld [vmem:[%s1123_s25 + $0x198] ss:$2 sm:$0xf]  ;;  %v870_v9 = vld [vmem:[%s1123_s25 + $0x1c1] ss:$2 sm:$0xf]  ;;  %v245_v10 = vadd.f32 %v807_v7, %v791_v4 }
  0x57   : > { %563 = vst.msk [vmem:[%s1161_s27 + $0x28] sm:$0xf] %vm552_vm0, %v546_v3  ;;  %v886_v13 = vld [vmem:[%s1123_s25 + $0x1c8] ss:$2 sm:$0xf] }
  0x58   : > { %v531_v11 = vadd.f32 %v901_v0, %v483_v5  ;;  %v388_v12 = vadd.f32 %v854_v2, %v340_v6  ;;  %v839_v14 = vld [vmem:[%s1123_s25 + $0x199] ss:$2 sm:$0xf]  ;;  %v902_v15 = vld [vmem:[%s1123_s25 + $0x1c9] ss:$2 sm:$0xf]  ;;  %v293_v16 = vadd.f32 %v823_v8, %v245_v10 }
  0x59   : > { %v855_v17 = vld [vmem:[%s1123_s25 + $0x1d0] ss:$2 sm:$0xf]  ;;  %v792_v20 = vld [vmem:[%s1123_s25 + $0x1a0] ss:$2 sm:$0xf] }
  0x5a   : > { %v547_v18 = vmul.f32 0.125, %v531_v11  ;;  %v436_v19 = vadd.f32 %v870_v9, %v388_v12  ;;  %v341_v21 = vadd.f32 %v839_v14, %v293_v16  ;;  %v808_v22 = vld [vmem:[%s1123_s25 + $0x1a1] ss:$2 sm:$0xf] }
  0x5b   : > { %v824_v23 = vld [vmem:[%s1123_s25 + $0x1a8] ss:$2 sm:$0xf]  ;;  %v871_v25 = vld [vmem:[%s1123_s25 + $0x1d1] ss:$2 sm:$0xf]  ;;  %v246_v26 = vadd.f32 %v808_v22, %v792_v20 }
  0x5c   : > { %564 = vst.msk [vmem:[%s1161_s27 + $0x2c] sm:$0xf] %vm552_vm0, %v547_v18  ;;  %v484_v24 = vadd.f32 %v886_v13, %v436_v19  ;;  %v389_v27 = vadd.f32 %v855_v17, %v341_v21  ;;  %v887_v28 = vld [vmem:[%s1123_s25 + $0x1d8] ss:$2 sm:$0xf] }
  0x5d   : > { %v840_v29 = vld [vmem:[%s1123_s25 + $0x1a9] ss:$2 sm:$0xf]  ;;  %v903_v31 = vld [vmem:[%s1123_s25 + $0x1d9] ss:$2 sm:$0xf]  ;;  %v294_v32 = vadd.f32 %v824_v23, %v246_v26 }
  0x5e   : > { %v532_v30 = vadd.f32 %v902_v15, %v484_v24  ;;  %v856_v33 = vld [vmem:[%s1123_s25 + $0x1e0] ss:$2 sm:$0xf]  ;;  %v437_v34 = vadd.f32 %v871_v25, %v389_v27  ;;  %v793_v35 = vld [vmem:[%s1123_s25 + $0x1b0] ss:$2 sm:$0xf] }
  0x5f   : > { %v809_v36 = vld [vmem:[%s1123_s25 + $0x1b1] ss:$2 sm:$0xf]  ;;  %v342_v38 = vadd.f32 %v840_v29, %v294_v32  ;;  %v825_v40 = vld [vmem:[%s1123_s25 + $0x1b8] ss:$2 sm:$0xf] }
  0x60   : > { %v548_v37 = vmul.f32 0.125, %v532_v30  ;;  %v247_v39 = vadd.f32 %v809_v36, %v793_v35  ;;  %v485_v41 = vadd.f32 %v887_v28, %v437_v34  ;;  %v872_v42 = vld [vmem:[%s1123_s25 + $0x1e1] ss:$2 sm:$0xf] }
  0x61   : > { %v841_v43 = vld [vmem:[%s1123_s25 + $0x1b9] ss:$2 sm:$0xf]  ;;  %v390_v44 = vadd.f32 %v856_v33, %v342_v38  ;;  %v888_v47 = vld [vmem:[%s1123_s25 + $0x1e8] ss:$2 sm:$0xf] }
  0x62   : > { %565 = vst.msk [vmem:[%s1161_s27 + $0x30] sm:$0xf] %vm552_vm0, %v548_v37  ;;  %v295_v45 = vadd.f32 %v825_v40, %v247_v39  ;;  %v533_v46 = vadd.f32 %v903_v31, %v485_v41  ;;  %v857_v48 = vld [vmem:[%s1123_s25 + $0x1f0] ss:$2 sm:$0xf] }
  0x63   : > { %v438_v49 = vadd.f32 %v872_v42, %v390_v44  ;;  %v904_v50 = vld [vmem:[%s1123_s25 + $0x1e9] ss:$2 sm:$0xf]  ;;  %v873_v53 = vld [vmem:[%s1123_s25 + $0x1f1] ss:$2 sm:$0xf] }
  0x64   : > { %v343_v51 = vadd.f32 %v841_v43, %v295_v45  ;;  %v549_v52 = vmul.f32 0.125, %v533_v46  ;;  %v889_v56 = vld [vmem:[%s1123_s25 + $0x1f8] ss:$2 sm:$0xf] }
  0x65   : > { %v486_v54 = vadd.f32 %v888_v47, %v438_v49  ;;  %v905_v59 = vld [vmem:[%s1123_s25 + $0x1f9] ss:$2 sm:$0xf] }
  0x66   : > { %v391_v55 = vadd.f32 %v857_v48, %v343_v51  ;;  %566 = vst.msk [vmem:[%s1161_s27 + $0x34] sm:$0xf] %vm552_vm0, %v549_v52 }
  0x67   : > { %v534_v57 = vadd.f32 %v904_v50, %v486_v54 }
  0x68   : > { %v439_v58 = vadd.f32 %v873_v53, %v391_v55 }
  0x69   : > { %v550_v60 = vmul.f32 0.125, %v534_v57 }
  0x6a   : > { %v487_v61 = vadd.f32 %v889_v56, %v439_v58 }
  0x6b   : > { %567 = vst.msk [vmem:[%s1161_s27 + $0x38] sm:$0xf] %vm552_vm0, %v550_v60 }
  0x6c   : > { %v535_v62 = vadd.f32 %v905_v59, %v487_v61 }
  0x6e   : > { %v551_v63 = vmul.f32 0.125, %v535_v62 }
  0x70   : > { %568 = vst.msk [vmem:[%s1161_s27 + $0x3c] sm:$0xf] %vm552_vm0, %v551_v63 }
  0x71   : > { %997 = shalt.err (!%p994_p5)
}
  0x72   : > { %s1050_s22 = smov 64   ;;  %s1051_s23 = smov 4  }
  0x73   : > { %913 = dma.vmem_to_hbm [thread:$0]  (%p1102_p4), %s587_s3, 1024, %s589_s4, %s570_s5, %s1050_s22, %s1050_s22, %s1051_s23  }
  0x74 PF: > { %p919_p6 = scmp.ge.s32.totalorder %s1048_s11, 2  ;;  %s603_s24 = sand.u32 1, %s1028_s6  }
  0x75   : > { %s604_s25 = scalar_lea.sflag [#allocation3], %s603_s24 }
  0x76   : > { %p916_p7 = pnand %p919_p6, %p1109_p8 }
  0x78   : > { %p917_p9 = pneg %p916_p7 }
  0x7a   : > { %1023 = dma.done.wait (%p917_p9), %s604_s25, 1024  }
  0x7b   : > { %1025 = vsyncadd (%p917_p9), %s604_s25, 4294966272  ;;  %s14_s11 = sadd.s32 1, %s1048_s11   ;;  %s1335_s6 = smov %s1032_s7 }
  0x7c   : > { %p11_p10 = scmp.ge.s32.totalorder %s14_s11, 4   ;;  %s1336_s7 = smov %s1036_s8 }
  0x7d   : > { %s1337_s8 = smov %s1115_s19  ;;  %s1338_s9 = smov %s1044_s10 }
  0x7e   : > { %s1339_s10 = smov %s1341_s14  ;;  %13 = sbr.rel (!%p11_p10) target bundleno = 4 (0x4), region = 186 }
  0x83   :  { %610 = vsyncpa [#allocation3], 1 }
  0x84   :  { %612 = vsyncpa [#allocation3 + $0x1], 1 }

</bundles_post_ra>
